<compile_context>
chip_gen: v7x
topology: tpu7x:2x2x1
jax: 0.10.0
libtpu: 0.0.40
codegen_flags: <defaults>
</compile_context>

<pallas_src>
import functools

import jax
import jax.numpy as jnp
from jax import lax
from jax.experimental import pallas as pl
from jax.experimental.pallas import tpu as pltpu

_NEG_BIG = -1e30


def _round_up(x, m):
    return ((x + m - 1) // m) * m


def _contrastive_kernel(im_ref, s_ref, row_bias_ref, col_bias_ref, col_pad_ref,
                        out_cols_ref, out_row_ref, *, max_violation, n_valid):
    tile = im_ref.shape[0]
    n_pad = s_ref.shape[0]
    r0 = pl.program_id(0) * tile

    # Single MXU matmul, f32 accumulation: sc[k, j] = scores[r0 + k, j].
    sc = lax.dot_general(im_ref[...], s_ref[...], (((1,), (1,)), ((), ())),
                         preferred_element_type=jnp.float32)

    # col_pad is 0 on valid columns, -1e30 on padded columns -> padded columns
    # hinge to exactly 0 for both cost terms with a single shared add.
    t = sc + col_pad_ref[...]                                   # (tile, n_pad)

    # Diagonal + padded-row mask: one compare + one AND per element,
    # one select per cost tensor (relu >= 0 makes masked-to-0 safe for sum/max).
    col_ids = lax.broadcasted_iota(jnp.int32, (1, n_pad), 1)
    row_ids = lax.broadcasted_iota(jnp.int32, (tile, 1), 0) + r0
    keep = jnp.logical_and(col_ids != row_ids, row_ids < n_valid)

    # cost_s[k, j]  = relu(margin + scores[r0+k, j] - diag[r0+k])
    # cost_im[k, j] = relu(margin + scores[r0+k, j] - diag[j])
    cost_s = jnp.where(keep, jnp.maximum(t + row_bias_ref[...], 0.0), 0.0)
    cost_im = jnp.where(keep, jnp.maximum(t + col_bias_ref[...], 0.0), 0.0)

    if max_violation:
        # Running piece of cost_im.max(0): per-tile column max (sublane reduce).
        out_cols_ref[0] = jnp.max(cost_im, axis=0, keepdims=True)
        # cost_s.max(1).sum() restricted to this tile's rows (scalar per tile).
        row_part = jnp.sum(jnp.max(cost_s, axis=1, keepdims=True))
        out_row_ref[0] = jnp.broadcast_to(row_part, (1, 128))
    else:
        # Sublane-only reduction per step; the lane-wide sum happens once in
        # the wrapper over the (num_tiles, n_pad) partials.
        out_cols_ref[0] = jnp.sum(cost_s + cost_im, axis=0, keepdims=True)
        out_row_ref[0] = jnp.zeros((1, 128), jnp.float32)


def contrastive_loss(im, s, margin=0.0, max_violation=False, tile_rows=256,
                     matmul_dtype=None):
    """im: (N, D); s: (N, D). Returns the scalar max-margin contrastive loss."""
    im = jnp.asarray(im)
    s = jnp.asarray(s)
    common = jnp.promote_types(im.dtype, s.dtype)
    im = im.astype(common)
    s = s.astype(common)
    n, d = im.shape
    assert s.shape == (n, d), (im.shape, s.shape)

    # Exact diagonal scores.diag() as a cheap rowwise dot in f32 (O(N*D)).
    diag = jnp.sum(im.astype(jnp.float32) * s.astype(jnp.float32), axis=1)

    # bf16 is the native MXU fast path for f32 inputs (f32 accumulation kept).
    if matmul_dtype is None:
        matmul_dtype = jnp.bfloat16 if common == jnp.dtype(jnp.float32) else common
    matmul_dtype = jnp.dtype(matmul_dtype)
    itemsize = matmul_dtype.itemsize
    sublane = max(8, 32 // max(itemsize, 1))        # 8 (f32) / 16 (bf16) / 32 (int8)

    d_pad = _round_up(d, 128)                       # lane-dense feature dim
    tile = min(_round_up(int(tile_rows), sublane), _round_up(n, sublane))
    n_pad = _round_up(n, tile)
    num_tiles = n_pad // tile

    im_mm = im.astype(matmul_dtype)
    s_mm = s.astype(matmul_dtype)
    if (n_pad, d_pad) != (n, d):
        im_p = jnp.zeros((n_pad, d_pad), matmul_dtype).at[:n, :d].set(im_mm)
        s_p = jnp.zeros((n_pad, d_pad), matmul_dtype).at[:n, :d].set(s_mm)
    else:
        im_p, s_p = im_mm, s_mm

    # Bias vectors with margin and -diag folded in; -1e30 entries force padded
    # rows / columns to a zero hinge so the kernel needs no padding iota work.
    idx = jnp.arange(n_pad)
    valid = idx < n
    diag_p = jnp.zeros((n_pad,), jnp.float32).at[:n].set(diag)
    bias = jnp.where(valid, jnp.float32(margin) - diag_p, jnp.float32(_NEG_BIG))
    row_bias = bias.reshape(n_pad, 1)               # margin - diag[row]
    col_bias = bias.reshape(1, n_pad)               # margin - diag[col]
    col_pad = jnp.where(valid, 0.0, _NEG_BIG).astype(jnp.float32).reshape(1, n_pad)

    kernel = functools.partial(_contrastive_kernel,
                               max_violation=bool(max_violation),
                               n_valid=int(n))

    # VMEM budget: double-buffered im tiles + resident s (allow 2 buffers) +
    # f32 score/cost temporaries + bias vectors + partial outputs + slack.
    f32b = 4
    vmem_need = (2 * tile * d_pad * itemsize
                 + 2 * n_pad * d_pad * itemsize
                 + 6 * tile * n_pad * f32b
                 + 6 * n_pad * f32b + 2 * tile * f32b
                 + 2 * (n_pad + 128) * f32b
                 + (2 << 20))
    # TODO(synk): for very large N*D add a second grid axis over column blocks
    # of s so the resident RHS also fits v7x's 64 MiB VMEM; unnecessary here.
    vmem_limit = int(min(max(vmem_need, 32 << 20), 64 << 20))

    cost = pl.CostEstimate(
        flops=2 * n_pad * n_pad * d_pad,            # single (n x d) @ (d x n) matmul
        transcendentals=0,
        bytes_accessed=int(2 * n_pad * d_pad * itemsize
                           + (3 * n_pad + num_tiles * (n_pad + 128)) * f32b),
    )

    out_cols, out_row = pl.pallas_call(
        kernel,
        out_shape=(jax.ShapeDtypeStruct((num_tiles, 1, n_pad), jnp.float32),
                   jax.ShapeDtypeStruct((num_tiles, 1, 128), jnp.float32)),
        grid=(num_tiles,),
        in_specs=[
            pl.BlockSpec((tile, d_pad), lambda i: (i, 0)),    # im row tile (pipelined)
            pl.BlockSpec((n_pad, d_pad), lambda i: (0, 0)),   # s resident (matmul RHS)
            pl.BlockSpec((tile, 1), lambda i: (i, 0)),        # margin - diag[row]
            pl.BlockSpec((1, n_pad), lambda i: (0, 0)),       # margin - diag[col]
            pl.BlockSpec((1, n_pad), lambda i: (0, 0)),       # column padding bias
        ],
        out_specs=(
            pl.BlockSpec((1, 1, n_pad), lambda i: (i, 0, 0)),
            pl.BlockSpec((1, 1, 128), lambda i: (i, 0, 0)),
        ),
        compiler_params=pltpu.CompilerParams(
            dimension_semantics=("parallel",),
            vmem_limit_bytes=vmem_limit,
        ),
        cost_estimate=cost,
    )(im_p, s_p, row_bias, col_bias, col_pad)

    if max_violation:
        # cost_s.max(1).sum() (per-tile scalars) + cost_im.max(0).sum()
        # (cross-tile column max finalized here).
        return jnp.sum(out_row[:, 0, 0]) + jnp.sum(jnp.max(out_cols[:, 0, :], axis=0))
    return jnp.sum(out_cols)


def _reference(im, s, margin, max_violation):
    scores = jnp.einsum("id,jd->ij", im, s, precision=lax.Precision.HIGHEST)
    diag = jnp.diag(scores)
    cost_s = jnp.maximum(margin + scores - diag[:, None], 0.0)
    cost_im = jnp.maximum(margin + scores - diag[None, :], 0.0)
    eye = jnp.eye(scores.shape[0], dtype=bool)
    cost_s = jnp.where(eye, 0.0, cost_s)
    cost_im = jnp.where(eye, 0.0, cost_im)
    if max_violation:
        return jnp.sum(jnp.max(cost_s, axis=1)) + jnp.sum(jnp.max(cost_im, axis=0))
    return jnp.sum(cost_s) + jnp.sum(cost_im)


if __name__ == "__main__":
    key = jax.random.PRNGKey(0)
    k1, k2, k3, k4 = jax.random.split(key, 4)

    # Case 1: batch N=8, feature dim D=32 (single grid tile, padded rows/cols).
    n, d = 8, 32
    im = jax.random.normal(k1, (n, d), dtype=jnp.float32)
    s = jax.random.normal(k2, (n, d), dtype=jnp.float32)
    for mv in (False, True):                         # VSE0 and VSE++ objectives
        ref = _reference(im, s, 0.2, mv)
        got = jax.block_until_ready(
            contrastive_loss(im, s, margin=0.2, max_violation=mv))
        err = abs(float(got) - float(ref))
        assert err <= 1e-2 * max(1.0, abs(float(ref))), (mv, float(got), float(ref))
        # Exact-f32 matmul path.
        got32 = jax.block_until_ready(
            contrastive_loss(im, s, margin=0.2, max_violation=mv,
                             matmul_dtype=jnp.float32))
        err32 = abs(float(got32) - float(ref))
        assert err32 <= 1e-2 * max(1.0, abs(float(ref))), (mv, float(got32), float(ref))

    # Case 2: ragged shapes + multiple grid tiles (exercises padding/masking,
    # per-tile partial outputs and the cross-tile column max for VSE++).
    n2, d2 = 37, 50
    im2 = jax.random.normal(k3, (n2, d2), dtype=jnp.float32)
    s2 = jax.random.normal(k4, (n2, d2), dtype=jnp.float32)
    for mv in (False, True):
        ref = _reference(im2, s2, 0.2, mv)
        got = jax.block_until_ready(
            contrastive_loss(im2, s2, margin=0.2, max_violation=mv, tile_rows=16))
        err = abs(float(got) - float(ref))
        assert err <= 1e-2 * max(1.0, abs(float(ref))), (mv, float(got), float(ref))

    print("KERNEL_OK")
</pallas_src>

<mosaic_0001>
module attributes {stable_mosaic.version = 11 : i64} {
  func.func @_contrastive_kernel(%arg0: i32, %arg1: memref<16x128xbf16, #tpu.memory_space<vmem>>, %arg2: memref<16x128xbf16, #tpu.memory_space<vmem>>, %arg3: memref<16x1xf32, #tpu.memory_space<vmem>>, %arg4: memref<1x16xf32, #tpu.memory_space<vmem>>, %arg5: memref<1x16xf32, #tpu.memory_space<vmem>>, %arg6: memref<1x1x16xf32, #tpu.memory_space<vmem>>, %arg7: memref<1x1x128xf32, #tpu.memory_space<vmem>>) attributes {dimension_semantics = [#tpu.dimension_semantics<parallel>], iteration_bounds = array<i64: 1>, scalar_prefetch = 0 : i64, scratch_operands = 0 : i64, tpu.core_type = #tpu.core_type<tc>, window_params = [{transform_indices = @transform_0, window_bounds = array<i64: 16, 128>}, {pipeline_mode = #tpu.pipeline_mode<synchronous>, transform_indices = @transform_1, window_bounds = array<i64: 16, 128>}, {transform_indices = @transform_2, window_bounds = array<i64: 16, 1>}, {pipeline_mode = #tpu.pipeline_mode<synchronous>, transform_indices = @transform_3, window_bounds = array<i64: 1, 16>}, {pipeline_mode = #tpu.pipeline_mode<synchronous>, transform_indices = @transform_4, window_bounds = array<i64: 1, 16>}, {transform_indices = @transform_5, window_bounds = array<i64: 1, 1, 16>}, {transform_indices = @transform_6, window_bounds = array<i64: 1, 1, 128>}]} {
    %c16_i32 = arith.constant 16 : i32
    %0 = arith.muli %arg0, %c16_i32 : i32
    %c0 = arith.constant 0 : index
    %c0_0 = arith.constant 0 : index
    %1 = vector.load %arg1[%c0, %c0_0] : memref<16x128xbf16, #tpu.memory_space<vmem>>, vector<16x128xbf16>
    %c0_1 = arith.constant 0 : index
    %c0_2 = arith.constant 0 : index
    %2 = vector.load %arg2[%c0_1, %c0_2] : memref<16x128xbf16, #tpu.memory_space<vmem>>, vector<16x128xbf16>
    %cst = arith.constant dense<0.000000e+00> : vector<16x16xf32>
    %3 = tpu.matmul %1, %2, %cst {dimension_numbers = #tpu.dot_dimension_numbers<[1], [1], [0], [0], [0, 0, 1, 0], [], []>} : vector<16x128xbf16>, vector<16x128xbf16>, vector<16x16xf32> -> vector<16x16xf32>
    %c0_3 = arith.constant 0 : index
    %c0_4 = arith.constant 0 : index
    %4 = vector.load %arg5[%c0_3, %c0_4] : memref<1x16xf32, #tpu.memory_space<vmem>>, vector<1x16xf32>
    %5 = vector.broadcast %4 : vector<1x16xf32> to vector<16x16xf32>
    %6 = arith.addf %3, %5 : vector<16x16xf32>
    %7 = tpu.iota {dimensions = array<i32: 1>} : vector<1x16xi32>
    %8 = tpu.iota {dimensions = array<i32: 0>} : vector<16x1xi32>
    %9 = vector.broadcast %0 : i32 to vector<16x1xi32>
    %10 = arith.addi %8, %9 : vector<16x1xi32>
    %11 = vector.broadcast %7 : vector<1x16xi32> to vector<16x16xi32>
    %12 = vector.broadcast %10 : vector<16x1xi32> to vector<16x16xi32>
    %13 = arith.cmpi ne, %11, %12 : vector<16x16xi32>
    %c8_i32 = arith.constant 8 : i32
    %14 = vector.broadcast %c8_i32 : i32 to vector<16x1xi32>
    %15 = arith.cmpi slt, %10, %14 : vector<16x1xi32>
    %16 = vector.broadcast %15 : vector<16x1xi1> to vector<16x16xi1>
    %17 = arith.andi %13, %16 : vector<16x16xi1>
    %c0_5 = arith.constant 0 : index
    %c0_6 = arith.constant 0 : index
    %18 = vector.load %arg3[%c0_5, %c0_6] : memref<16x1xf32, #tpu.memory_space<vmem>>, vector<16x1xf32>
    %19 = vector.broadcast %18 : vector<16x1xf32> to vector<16x16xf32>
    %20 = arith.addf %6, %19 : vector<16x16xf32>
    %cst_7 = arith.constant 0.000000e+00 : f32
    %21 = vector.broadcast %cst_7 : f32 to vector<16x16xf32>
    %22 = arith.maximumf %20, %21 : vector<16x16xf32>
    %cst_8 = arith.constant 0.000000e+00 : f32
    %23 = vector.broadcast %cst_8 : f32 to vector<16x16xf32>
    %24 = arith.select %17, %22, %23 : vector<16x16xi1>, vector<16x16xf32>
    %c0_9 = arith.constant 0 : index
    %c0_10 = arith.constant 0 : index
    %25 = vector.load %arg4[%c0_9, %c0_10] : memref<1x16xf32, #tpu.memory_space<vmem>>, vector<1x16xf32>
    %26 = vector.broadcast %25 : vector<1x16xf32> to vector<16x16xf32>
    %27 = arith.addf %6, %26 : vector<16x16xf32>
    %cst_11 = arith.constant 0.000000e+00 : f32
    %28 = vector.broadcast %cst_11 : f32 to vector<16x16xf32>
    %29 = arith.maximumf %27, %28 : vector<16x16xf32>
    %cst_12 = arith.constant 0.000000e+00 : f32
    %30 = vector.broadcast %cst_12 : f32 to vector<16x16xf32>
    %31 = arith.select %17, %29, %30 : vector<16x16xi1>, vector<16x16xf32>
    %32 = arith.addf %24, %31 : vector<16x16xf32>
    %cst_13 = arith.constant dense<0.000000e+00> : vector<16xf32>
    %33 = vector.multi_reduction <add>, %32, %cst_13 [0] : vector<16x16xf32> to vector<16xf32>
    %34 = vector.shape_cast %33 : vector<16xf32> to vector<1x16xf32>
    %c0_14 = arith.constant 0 : index
    %c0_15 = arith.constant 0 : index
    %c0_16 = arith.constant 0 : index
    %35 = vector.load %arg6[%c0_14, %c0_15, %c0_16] : memref<1x1x16xf32, #tpu.memory_space<vmem>>, vector<1x1x16xf32>
    %36 = vector.shape_cast %35 : vector<1x1x16xf32> to vector<1x16xf32>
    %37 = vector.shape_cast %34 : vector<1x16xf32> to vector<1x1x16xf32>
    tpu.vector_store %arg6[%c0_14, %c0_15, %c0_16], %37 {strides = array<i32>} : memref<1x1x16xf32, #tpu.memory_space<vmem>>, vector<1x1x16xf32>,
    %cst_17 = arith.constant 0.000000e+00 : f32
    %38 = vector.broadcast %cst_17 : f32 to vector<1x128xf32>
    %c0_18 = arith.constant 0 : index
    %c0_19 = arith.constant 0 : index
    %c0_20 = arith.constant 0 : index
    %39 = vector.load %arg7[%c0_18, %c0_19, %c0_20] : memref<1x1x128xf32, #tpu.memory_space<vmem>>, vector<1x1x128xf32>
    %40 = vector.shape_cast %39 : vector<1x1x128xf32> to vector<1x128xf32>
    %41 = vector.shape_cast %38 : vector<1x128xf32> to vector<1x1x128xf32>
    tpu.vector_store %arg7[%c0_18, %c0_19, %c0_20], %41 {strides = array<i32>} : memref<1x1x128xf32, #tpu.memory_space<vmem>>, vector<1x1x128xf32>,
    return
  }
  func.func @transform_0(%arg0: i32) -> (i32, i32) {
    %c0_i32 = arith.constant 0 : i32
    %c0_i32_0 = arith.constant 0 : i32
    return %arg0, %c0_i32 : i32, i32
  }
  func.func @transform_1(%arg0: i32) -> (i32, i32) {
    %c0_i32 = arith.constant 0 : i32
    %c0_i32_0 = arith.constant 0 : i32
    %c0_i32_1 = arith.constant 0 : i32
    return %c0_i32, %c0_i32_0 : i32, i32
  }
  func.func @transform_2(%arg0: i32) -> (i32, i32) {
    %c0_i32 = arith.constant 0 : i32
    %c0_i32_0 = arith.constant 0 : i32
    return %arg0, %c0_i32 : i32, i32
  }
  func.func @transform_3(%arg0: i32) -> (i32, i32) {
    %c0_i32 = arith.constant 0 : i32
    %c0_i32_0 = arith.constant 0 : i32
    %c0_i32_1 = arith.constant 0 : i32
    return %c0_i32, %c0_i32_0 : i32, i32
  }
  func.func @transform_4(%arg0: i32) -> (i32, i32) {
    %c0_i32 = arith.constant 0 : i32
    %c0_i32_0 = arith.constant 0 : i32
    %c0_i32_1 = arith.constant 0 : i32
    return %c0_i32, %c0_i32_0 : i32, i32
  }
  func.func @transform_5(%arg0: i32) -> (i32, i32, i32) {
    %c0_i32 = arith.constant 0 : i32
    %c0_i32_0 = arith.constant 0 : i32
    %c0_i32_1 = arith.constant 0 : i32
    return %arg0, %c0_i32, %c0_i32_0 : i32, i32, i32
  }
  func.func @transform_6(%arg0: i32) -> (i32, i32, i32) {
    %c0_i32 = arith.constant 0 : i32
    %c0_i32_0 = arith.constant 0 : i32
    %c0_i32_1 = arith.constant 0 : i32
    return %arg0, %c0_i32, %c0_i32_0 : i32, i32, i32
  }
}

</mosaic_0001>

<bundles_post_ra>
// kernel: tpu_custom_call.1
= control target key start
LH: loop header
LB: loop body
LE: loop exit
PB: predicated region body
PF: predicated region fallthrough
CT: control target
= control target key end

     0   :  { %12 = vsyncpa [#allocation3], 0  ;;  %v250_v1 = vmov 0.0   ;;  %vm251_vm0 = vmmov 0   ;;  %s329_s0 = inlined_call_operand.vmem [shape: bf16[16,128], index: 0, kind: input, shape index: {}]   ;;  %s330_s1 = inlined_call_operand.vmem [shape: bf16[16,128], index: 1, kind: input, shape index: {}]   ;;  %s331_s2 = inlined_call_operand.vmem [shape: f32[16,1], index: 2, kind: input, shape index: {}]   ;;  %s332_s3 = inlined_call_operand.vmem [shape: f32[1,16], index: 3, kind: input, shape index: {}]   ;;  %s333_s4 = inlined_call_operand.vmem [shape: f32[1,16], index: 4, kind: input, shape index: {}]   ;;  %s334_s5 = inlined_call_operand.hbm [shape: f32[1,1,16], index: 5, kind: output, shape index: {0}]   ;;  %s335_s6 = inlined_call_operand.hbm [shape: f32[1,1,128], index: 6, kind: output, shape index: {1}]  }
   0x1   :  { %v200_v0 = vld [vmem:[%s330_s1] sm:$0xff]   ;;  %188 = vmatprep.subr.bf16.mxu0 %v250_v1  ;;  %153 = vst [vmem:[#allocation4] sm:$0x1] %v250_v1  ;;  %190 = vmatprep.mubr.msk.bf16.mxu0 %vm251_vm0, %v250_v1 }
   0x2   :  { %189 = vmatpush3.bf16.xpose.msra.mxu0 %v200_v0  ;;  %v108_v2 = vld [vmem:[%s331_s2] sm:$0xff] }
   0x3   :  { %13 = vsyncpa [#allocation5], 0  ;;  %v252_v3 = vmov 0   ;;  %v201_v4 = vld [vmem:[%s329_s0] sm:$0xff]   ;;  %s253_s1 = smov [#allocation4]  }
   0x4   :  { %199 = vset.pattern.permute.xlu0 %v252_v3  ;;  %s170_s27 = sshll.u32 %s253_s1, 4  ;;  %s171_s27 = int_to_ptr.vmem [resolvable:$true] %s170_s27 }
   0x5   :  { %112 = vperm.xlu0 %199, %v108_v2   ;;  %s202_s28 = scalar_lea.vmem %s171_s27, 16  ;;  %s206_s29 = scalar_lea.vmem %s171_s27, 32 }
   0x6   :  { %p203_p0 = scmp.ne.s32.totalorder %s171_s27, %s202_s28  ;;  %p207_p1 = scmp.lt.s32.totalorder %s171_s27, %s171_s27 }
   0x7   :  { %p208_p2 = scmp.lt.s32.totalorder %s206_s29, %s202_s28 }
   0x9   :  { %191 = vmatmul.mubr.bf16.vlgmr.msra.gmra.mrb[0].mxu0 %v201_v4  ;;  %p209_p3 = por %p208_p2, %p207_p1 }
   0xb   :  { %p210_p4 = pnand %p209_p3, %p203_p0 }
   0xd   :  { %213 = shalt.err (!%p210_p4)
}
   0xe   :  { %s214_s7 = scalar_lea.hbm %s335_s6, 16 }
   0xf   :  { %p215_p5 = scmp.ne.s32.totalorder %s335_s6, %s214_s7  ;;  %p218_p6 = scmp.lt.u32.totalorder %s214_s7, %s335_s6 }
  0x11   :  { %p220_p7 = pnand %p218_p6, %p215_p5 }
  0x13   :  { %223 = shalt.err (!%p220_p7)
}
  0x14   :  { %173 = dma.vmem_to_hbm [thread:$0]  %s171_s27, 16, %s335_s6, [#allocation5]   ;;  %v90_v5 = vlaneseq  ;;  %v182_v6 = vld [vmem:[%s333_s4] ss:$0 sm:$0xff]  ;;  %vm141_vm2 = vcmask 130048   ;;  %vm151_vm3 = vcmask 122880  }
  0x15   :  { %v185_v8 = vld [vmem:[%s332_s3] ss:$0 sm:$0xff]  ;;  %s254_s3 = smov [#allocation2]  }
  0x16   :  { %v91_v10 = vand.u32 127, %v90_v5  ;;  %v93_v11 = vshrl.u32 %v90_v5, 7  ;;  %s160_s4 = sshll.u32 %s254_s3, 4  ;;  %s161_s4 = int_to_ptr.vmem [resolvable:$true] %s160_s4 }
  0x17   :  { %s224_s6 = scalar_lea.vmem %s161_s4, 16  ;;  %s228_s17 = scalar_lea.vmem %s161_s4, 32 }
  0x18   :  { %vm98_vm1 = vcmp.ne.s32.totalorder %v91_v10, %v93_v11  ;;  %p225_p8 = scmp.ne.s32.totalorder %s161_s4, %s224_s6  ;;  %p229_p9 = scmp.lt.s32.totalorder %s161_s4, %s161_s4 }
  0x19   :  { %p230_p10 = scmp.lt.s32.totalorder %s228_s17, %s224_s6 }
  0x1b   :  { %p231_p11 = por %p230_p10, %p229_p9 }
  0x1d   :  { %p232_p12 = pnand %p231_p11, %p225_p8 }
  0x84   :  { %v113_v9 = vpop.permute.xlu0 %112 }
  0xdc   :  { %v83_v7 = vpop.f32.mrb[0].mxu0 }
  0xdd   :  { %v84_v12 = vadd.f32 %v182_v6, %v83_v7  ;;  %v192_v13 = vpop.f32.mrb[1].mxu0 }
  0xde   :  { %v86_v14 = vpop.f32.mrb[2].mxu0 }
  0xdf   :  { %v133_v15 = vadd.f32 %v185_v8, %v84_v12  ;;  %v120_v16 = vadd.f32 %v113_v9, %v84_v12  ;;  %v193_v17 = vpop.f32.mrb[3].mxu0 }
  0xe1   :  { %v135_v18 = vmax.f32 %v133_v15, 0.0  ;;  %v122_v19 = vmax.f32 %v120_v16, 0.0 }
  0xe3   :  { %v124_v20 = vsel %vm98_vm1, %v122_v19, 0.0  ;;  %v137_v21 = vsel %vm98_vm1, %v135_v18, 0.0 }
  0xe4   :  { %v139_v22 = vadd.f32 %v137_v21, %v124_v20 }
  0xe6   :  { %v142_v23 = vsel %vm141_vm2, %v139_v22, 0.0 }
  0xe7   :  { %v145_v24 = vrot.slane %v142_v23, 4 }
  0xe9   :  { %v146_v25 = vadd.f32 %v145_v24, %v142_v23 }
  0xeb   :  { %v147_v26 = vrot.slane %v146_v25, 2 }
  0xed   :  { %v148_v27 = vadd.f32 %v147_v26, %v146_v25 }
  0xef   :  { %v149_v28 = vrot.slane %v148_v27, 1 }
  0xf1   :  { %v150_v29 = vadd.f32 %v149_v28, %v148_v27 }
  0xf3   :  { %152 = vst.msk [vmem:[#allocation2] sm:$0x1] %vm151_vm3, %v150_v29 }
  0xf4   :  { %235 = shalt.err (!%p232_p12)
}
  0xf5   :  { %s236_s20 = scalar_lea.hbm %s334_s5, 16 }
  0xf6   :  { %p237_p13 = scmp.ne.s32.totalorder %s334_s5, %s236_s20  ;;  %p240_p0 = scmp.lt.u32.totalorder %s236_s20, %s334_s5 }
  0xf8   :  { %p242_p1 = pnand %p240_p0, %p237_p13 }
  0xfa   :  { %245 = shalt.err (!%p242_p1)
}
  0xfb   :  { %163 = dma.vmem_to_hbm [thread:$0]  %s161_s4, 16, %s334_s5, [#allocation3]  }
  0xfc   :  { %246 = dma.done.wait [#allocation3], 16  }
  0xfd   :  { %247 = vsyncadd [#allocation3], 4294967280 }
  0xfe   :  { %248 = dma.done.wait [#allocation5], 16  }
  0xff   :  { %249 = vsyncadd [#allocation5], 4294967280 }
 0x100   :  { %180 = vsyncpa [#allocation3], 1 }
 0x101   :  { %181 = vsyncpa [#allocation5], 1 }

</bundles_post_ra>
